<compile_context>
chip_gen: v5e
topology: v5e:2x2
jax: 0.10.0
libtpu: 0.0.40
codegen_flags: <defaults>
</compile_context>

<pallas_src>
import jax
import jax.numpy as jnp
from jax.experimental import pallas as pl
from jax.experimental.pallas import tpu as pltpu


def _outconv_kernel(x_ref, w_ref, b_ref, o_ref):
    # x_ref: (1, Cin, THW)   input pixels for this (image, spatial tile)
    # w_ref: (Cout, Cin)     folded conv weight (BN scale absorbed), x.dtype
    # b_ref: (Cout, 1)       folded bias (conv bias + BN shift), f32
    # o_ref: (1, Cout, THW)
    x = x_ref[0]                                                     # (Cin, THW)
    y = jnp.dot(w_ref[...], x, preferred_element_type=jnp.float32)   # (Cout, THW)
    y = y + b_ref[...]                                               # lane broadcast
    o_ref[0] = jnp.maximum(y, 0.0).astype(o_ref.dtype)


def _round_up(x, m):
    return ((x + m - 1) // m) * m


def _vmem_capacity_bytes():
    """Physical VMEM per TensorCore; conservative fallback if unavailable."""
    try:
        cap = int(pltpu.get_tpu_info().vmem_capacity_bytes)
        if cap > 0:
            return cap
    except Exception:
        pass
    return 64 << 20  # conservative: v7x per-TC VMEM


def _select_tile_hw(HW, N, Cin, Cout, itemsize, pipeline_budget_bytes,
                    max_tile=32768):
    """Pick the spatial tile (lane count) from a VMEM byte budget.

    Budget covers the double-buffered input (Cin rows) + output (Cout rows)
    tiles.  Large tiles (8k-32k lanes) keep the HBM-bound kernel near the
    bandwidth roofline; divisibility of HW is NOT required (cdiv grid).
    """
    per_lane = 2 * (Cin + Cout) * itemsize               # double-buffered in+out
    budget_lanes = max(pipeline_budget_bytes // max(per_lane, 1), 128)
    tile = max(128, min((budget_lanes // 128) * 128, max_tile))
    if tile >= HW:
        # One spatial block covers the whole image.  If that would leave a
        # single-step grid (N == 1), split so both v7x TensorCores get work.
        if N == 1 and HW >= 256:
            tile = _round_up(-(-HW // 2), 128)           # < HW by construction
        else:
            tile = HW                                    # full-dim block (always legal)
    return tile


def outconv_forward(x_nchw, conv_w, conv_b, bn_gamma, bn_beta,
                    bn_mean, bn_var, eps=1e-5, max_tile_hw=32768):
    """1x1 conv + BatchNorm2d(eval) + ReLU.  x_nchw: (N, Cin, H, W)."""
    N, Cin, H, W = x_nchw.shape
    Cout = conv_w.shape[0]
    HW = H * W
    itemsize = jnp.dtype(x_nchw.dtype).itemsize

    # Fold BN into the conv weights / bias:
    #   y = relu( (W x + b) * scale + shift ) = relu( (W*scale) x + (b*scale+shift) )
    scale = bn_gamma / jnp.sqrt(bn_var + eps)                       # (Cout,)
    shift = bn_beta - bn_mean * scale                               # (Cout,)
    w2d = (conv_w.reshape(Cout, Cin) * scale[:, None]).astype(x_nchw.dtype)
    b2d = (conv_b * scale + shift).reshape(Cout, 1).astype(jnp.float32)

    # View as (N, Cin, H*W); pure reshape of contiguous data, no extra HBM pass.
    x3d = x_nchw.reshape(N, Cin, HW)

    # Generation-aware VMEM budgeting.
    vmem_capacity = _vmem_capacity_bytes()
    if vmem_capacity >= (100 << 20):       # v5e / v6e: 128 MiB physical
        pipeline_budget = 48 << 20
        vmem_limit_cap = 100 << 20
    else:                                  # v7x: 64 MiB physical per TC
        pipeline_budget = 20 << 20
        vmem_limit_cap = 40 << 20

    tile_hw = _select_tile_hw(HW, N, Cin, Cout, itemsize,
                              pipeline_budget, max_tile=max_tile_hw)
    n_sp = -(-HW // tile_hw)               # cdiv; last block may be ragged (masked)
    grid = (N, n_sp)

    needed = (2 * (Cin + Cout) * tile_hw * itemsize     # double-buffered in/out
              + Cout * Cin * itemsize + Cout * 4)       # weights + bias
    vmem_limit = int(min(max(needed * 5 // 4 + (1 << 20), 16 << 20),
                         vmem_limit_cap))

    out3d = pl.pallas_call(
        _outconv_kernel,
        out_shape=jax.ShapeDtypeStruct((N, Cout, HW), x_nchw.dtype),
        grid_spec=pltpu.PrefetchScalarGridSpec(
            num_scalar_prefetch=0,
            grid=grid,
            in_specs=[
                pl.BlockSpec((1, Cin, tile_hw), lambda n, j: (n, 0, j)),
                pl.BlockSpec((Cout, Cin), lambda n, j: (0, 0)),
                pl.BlockSpec((Cout, 1), lambda n, j: (0, 0)),
            ],
            out_specs=pl.BlockSpec((1, Cout, tile_hw), lambda n, j: (n, 0, j)),
        ),
        compiler_params=pltpu.CompilerParams(
            dimension_semantics=("parallel", "parallel"),
            vmem_limit_bytes=vmem_limit),
    )(x3d, w2d, b2d)

    return out3d.reshape(N, Cout, H, W)


def _ref_outconv(x, conv_w, conv_b, bn_gamma, bn_beta, bn_mean, bn_var, eps=1e-5):
    """Plain-JAX reference (inference-mode BN)."""
    Cout, Cin = conv_w.shape[0], conv_w.shape[1]
    x_nhwc = jnp.transpose(x, (0, 2, 3, 1))
    y = jnp.einsum("nhwc,oc->nhwo", x_nhwc, conv_w.reshape(Cout, Cin)) + conv_b
    scale = bn_gamma / jnp.sqrt(bn_var + eps)
    y = y * scale + (bn_beta - bn_mean * scale)
    y = jnp.maximum(y, 0.0)
    return jnp.transpose(y, (0, 3, 1, 2))


if __name__ == "__main__":
    key = jax.random.PRNGKey(0)
    N, Cin, Cout, Hs, Ws = 2, 4, 4, 16, 16

    k_x, k_w, k_b, k_x2 = jax.random.split(key, 4)
    x = jax.random.normal(k_x, (N, Cin, Hs, Ws), dtype=jnp.float32)

    # Deterministic parameter init (shapes from nn.Conv2d(in_ch, out_ch, 1)).
    conv_w = jax.random.normal(k_w, (Cout, Cin, 1, 1), dtype=jnp.float32) * 0.1
    conv_b = jax.random.normal(k_b, (Cout,), dtype=jnp.float32) * 0.1

    # BatchNorm2d default init: gamma=1, beta=0, running_mean=0, running_var=1.
    bn_gamma = jnp.ones((Cout,), jnp.float32)
    bn_beta = jnp.zeros((Cout,), jnp.float32)
    bn_mean = jnp.zeros((Cout,), jnp.float32)
    bn_var = jnp.ones((Cout,), jnp.float32)

    # --- main check: H*W a multiple of 128, single spatial block per image ---
    out = outconv_forward(x, conv_w, conv_b, bn_gamma, bn_beta, bn_mean, bn_var)
    out = jax.block_until_ready(out)
    ref = _ref_outconv(x, conv_w, conv_b, bn_gamma, bn_beta, bn_mean, bn_var)
    assert out.shape == (N, Cout, Hs, Ws)
    assert jnp.allclose(out, ref, atol=1e-5, rtol=1e-5)

    # --- ragged spatial extent (H*W = 400, not a multiple of 128) ---
    x2 = jax.random.normal(k_x2, (N, Cin, 20, 20), dtype=jnp.float32)
    ref2 = _ref_outconv(x2, conv_w, conv_b, bn_gamma, bn_beta, bn_mean, bn_var)

    # full-dim spatial block (tile == HW)
    out2 = jax.block_until_ready(
        outconv_forward(x2, conv_w, conv_b, bn_gamma, bn_beta, bn_mean, bn_var))
    assert out2.shape == (N, Cout, 20, 20)
    assert jnp.allclose(out2, ref2, atol=1e-5, rtol=1e-5)

    # forced small tile -> cdiv grid with a masked ragged last block
    out3 = jax.block_until_ready(
        outconv_forward(x2, conv_w, conv_b, bn_gamma, bn_beta, bn_mean, bn_var,
                        max_tile_hw=128))
    assert jnp.allclose(out3, ref2, atol=1e-5, rtol=1e-5)

    print("KERNEL_OK")
</pallas_src>

<mosaic_0001>
module attributes {stable_mosaic.version = 11 : i64} {
  func.func @_outconv_kernel(%arg0: i32, %arg1: i32, %arg2: memref<1x4x256xf32, #tpu.memory_space<vmem>>, %arg3: memref<4x4xf32, #tpu.memory_space<vmem>>, %arg4: memref<4x1xf32, #tpu.memory_space<vmem>>, %arg5: memref<1x4x256xf32, #tpu.memory_space<vmem>>) attributes {dimension_semantics = [#tpu.dimension_semantics<parallel>, #tpu.dimension_semantics<parallel>], iteration_bounds = array<i64: 2, 1>, scalar_prefetch = 0 : i64, scratch_operands = 0 : i64, tpu.core_type = #tpu.core_type<tc>, window_params = [{transform_indices = @transform_0, window_bounds = array<i64: 1, 4, 256>}, {pipeline_mode = #tpu.pipeline_mode<synchronous>, transform_indices = @transform_1, window_bounds = array<i64: 4, 4>}, {pipeline_mode = #tpu.pipeline_mode<synchronous>, transform_indices = @transform_2, window_bounds = array<i64: 4, 1>}, {transform_indices = @transform_3, window_bounds = array<i64: 1, 4, 256>}]} {
    %c0 = arith.constant 0 : index
    %c0_0 = arith.constant 0 : index
    %c0_1 = arith.constant 0 : index
    %0 = vector.load %arg2[%c0, %c0_0, %c0_1] : memref<1x4x256xf32, #tpu.memory_space<vmem>>, vector<1x4x256xf32>
    %1 = vector.shape_cast %0 : vector<1x4x256xf32> to vector<4x256xf32>
    %c0_2 = arith.constant 0 : index
    %c0_3 = arith.constant 0 : index
    %2 = vector.load %arg3[%c0_2, %c0_3] : memref<4x4xf32, #tpu.memory_space<vmem>>, vector<4x4xf32>
    %cst = arith.constant dense<0.000000e+00> : vector<4x256xf32>
    %3 = tpu.matmul %2, %1, %cst {dimension_numbers = #tpu.dot_dimension_numbers<[1], [0], [0], [1], [0, 0, 1, 1], [], []>} : vector<4x4xf32>, vector<4x256xf32>, vector<4x256xf32> -> vector<4x256xf32>
    %c0_4 = arith.constant 0 : index
    %c0_5 = arith.constant 0 : index
    %4 = vector.load %arg4[%c0_4, %c0_5] : memref<4x1xf32, #tpu.memory_space<vmem>>, vector<4x1xf32>
    %5 = vector.broadcast %4 : vector<4x1xf32> to vector<4x256xf32>
    %6 = arith.addf %3, %5 : vector<4x256xf32>
    %cst_6 = arith.constant 0.000000e+00 : f32
    %7 = vector.broadcast %cst_6 : f32 to vector<4x256xf32>
    %8 = arith.maximumf %6, %7 : vector<4x256xf32>
    %c0_7 = arith.constant 0 : index
    %c0_8 = arith.constant 0 : index
    %c0_9 = arith.constant 0 : index
    %9 = vector.load %arg5[%c0_7, %c0_8, %c0_9] : memref<1x4x256xf32, #tpu.memory_space<vmem>>, vector<1x4x256xf32>
    %10 = vector.shape_cast %9 : vector<1x4x256xf32> to vector<4x256xf32>
    %11 = vector.shape_cast %8 : vector<4x256xf32> to vector<1x4x256xf32>
    tpu.vector_store %arg5[%c0_7, %c0_8, %c0_9], %11 {strides = array<i32>} : memref<1x4x256xf32, #tpu.memory_space<vmem>>, vector<1x4x256xf32>,
    return
  }
  func.func @transform_0(%arg0: i32, %arg1: i32) -> (i32, i32, i32) {
    %c0_i32 = arith.constant 0 : i32
    %c0_i32_0 = arith.constant 0 : i32
    return %arg0, %c0_i32, %arg1 : i32, i32, i32
  }
  func.func @transform_1(%arg0: i32, %arg1: i32) -> (i32, i32) {
    %c0_i32 = arith.constant 0 : i32
    %c0_i32_0 = arith.constant 0 : i32
    %c0_i32_1 = arith.constant 0 : i32
    return %c0_i32, %c0_i32_0 : i32, i32
  }
  func.func @transform_2(%arg0: i32, %arg1: i32) -> (i32, i32) {
    %c0_i32 = arith.constant 0 : i32
    %c0_i32_0 = arith.constant 0 : i32
    %c0_i32_1 = arith.constant 0 : i32
    return %c0_i32, %c0_i32_0 : i32, i32
  }
  func.func @transform_3(%arg0: i32, %arg1: i32) -> (i32, i32, i32) {
    %c0_i32 = arith.constant 0 : i32
    %c0_i32_0 = arith.constant 0 : i32
    return %arg0, %c0_i32, %arg1 : i32, i32, i32
  }
}

</mosaic_0001>

<bundles_post_ra>
// kernel: tpu_custom_call.1
= control target key start
LH: loop header
LB: loop body
LE: loop exit
PB: predicated region body
PF: predicated region fallthrough
CT: control target
= control target key end

     0   :  { %8 = vsyncpa [#allocation3], 0  ;;  %s730_s0 = inlined_call_operand.hbm [shape: f32[2,4,256], index: 0, kind: input, shape index: {}]   ;;  %s731_s1 = inlined_call_operand.vmem [shape: f32[4,4], index: 1, kind: input, shape index: {}]   ;;  %s732_s2 = inlined_call_operand.vmem [shape: f32[4,1], index: 2, kind: input, shape index: {}]   ;;  %s733_s3 = inlined_call_operand.hbm [shape: f32[2,4,256], index: 3, kind: output, shape index: {}]  }
   0x1   :  { %10 = vsyncpa [#allocation3 + $0x1], 0 }
   0x2   :  { %11 = vsyncpa [#allocation4], 0 }
   0x3   :  { %13 = vsyncpa [#allocation4 + $0x1], 0  ;;  %s601_s12 = smov 0   ;;  %s603_s13 = smov 0  }
   0x4   :  { %s605_s14 = smov 0   ;;  %s607_s15 = smov 0  }
   0x5   :  { %s609_s16 = smov 0   ;;  %s611_s17 = smov 0  }
   0x6 LB: > { %s381_s18 = sadd.s32 4294967295, %s578_s17   ;;  %s382_s19 = sadd.s32 4294967294, %s578_s17   ;;  %s578_s17 = sphi %s611_s17, %s19_s17   ;;  %s574_s16 = sphi %s609_s16, %s742_s16   ;;  %s570_s15 = sphi %s607_s15, %s741_s15   ;;  %s566_s14 = sphi %s605_s14, %s740_s14   ;;  %s562_s13 = sphi %s603_s13, %s739_s13   ;;  %s558_s12 = sphi %s601_s12, %s738_s12  }
   0x7   : > { %s31_s20 = sadd.s32 1, %s574_s16  ;;  %s40_s21 = sadd.s32 1, %s566_s14 }
   0x8   : > { %p33_p0 = scmp.ge.s32.totalorder %s31_s20, 2  ;;  %p47_p1 = scmp.ne.s32.totalorder %s566_s14, %s562_s13 }
   0x9   : > { %p48_p2 = scmp.eq.s32.totalorder %s578_s17, 0  ;;  %p53_p3 = scmp.ne.s32.totalorder %s562_s13, %s558_s12 }
   0xa   : > { %s744_s20 = smov (%p33_p0, %s31_s20), 0  ;;  %p54_p5 = scmp.eq.s32.totalorder %s381_s18, 0 }
   0xb   : > { %p642_p4 = por %p48_p2, %p47_p1  ;;  %s35_s23 = ssub.s32 %s574_s16, %s744_s20 }
   0xc   : > { %p121_p6 = scmp.eq.s32.totalorder %s381_s18, 1  ;;  %p38_p7 = scmp.eq.s32.totalorder %s35_s23, 0 }
   0xd   : > { %p648_p8 = por %p54_p5, %p53_p3  ;;  %p127_p10 = scmp.eq.s32.totalorder %s382_s19, 1 }
   0xe   : > { %p652_p9 = por %p121_p6, %p47_p1  ;;  %p384_p12 = scmp.ge.s32.totalorder %s578_s17, 2 }
   0xf   : > { %s657_s26 = scalar_select %p38_p7, %s566_s14, %s40_s21  }
  0x10   : > { %p659_p11 = por %p127_p10, %p53_p3  ;;  %p414_p13 = scmp.lt.s32.totalorder %s578_s17, 2 }
  0x11   : > { %s153_s28 = sand.u32 1, %s566_s14   ;;  %s400_s30 = sshll.u32 %s574_s16, 3 }
  0x12   : > { %s385_s29 = sshll.u32 %s153_s28, 3  ;;  %s164_s6 = scalar_lea.hbm %s730_s0, %s400_s30 }
  0x13   : > { %s157_s7 = scalar_lea.vmem [#allocation2], %s385_s29  ;;  %s166_s9 = sshll.u32 %s164_s6, 4  ;;  %s167_s9 = int_to_ptr.hbm [resolvable:$true] %s166_s9 }
  0x14   : > { %s168_s8 = sshll.u32 %s157_s7, 4  ;;  %p407_p0 = pnand %p414_p13, %p642_p4  ;;  %s169_s8 = int_to_ptr.vmem [resolvable:$true] %s168_s8 }
  0x15   : > { %p388_p1 = scmp.ge.s32.totalorder %s578_s17, 1  ;;  %p173_p2 = scmp.lt.s32.totalorder %s578_s17, 3 }
  0x16   : > { %s154_s10 = scalar_lea.sflag [#allocation3], %s153_s28 }
  0x17   : > { %409 = dma.hbm_to_vmem [thread:$0]  (!%p407_p0), %s167_s9, 128, %s169_s8, %s154_s10  }
  0x18   : > { %p174_p3 = pnand %p388_p1, %p173_p2 }
  0x19   : > { %s675_s11 = sand.u32 (!%p174_p3), 1, %s562_s13  }
  0x1a   : > { %177 = sbr.rel (%p174_p3) target bundleno = 178 (0xb2), region = 32  ;;  %s389_s18 = sshll.u32 (!%p174_p3), %s675_s11, 3 }
  0x1b   : > { %s180_s19 = scalar_lea.sflag (!%p174_p3), [#allocation3], %s675_s11  ;;  %s183_s21 = scalar_lea.vmem (!%p174_p3), [#allocation2], %s389_s18 }
  0x1f   : > { %549 = dma.done.wait (%p648_p8), %s180_s19, 128  }
  0x20   : > { %551 = vsyncadd (%p648_p8), %s180_s19, 4294967168  ;;  %v580_v0 = vmov 0   ;;  %v209_v1 = vld [vmem:[%s183_s21] sm:$0xff]  ;;  %v211_v2 = vld [vmem:[%s732_s2] sm:$0xf]  ;;  %vm225_vm0 = vcmask 1043456  }
  0x21   : > { %465 = vset.pattern.permute.xlu0 %v580_v0  ;;  %218 = vst [vmem:[#allocation1] ss:$2 sm:$0xff] %v209_v1  ;;  %v210_v3 = vld [vmem:[%s731_s1] sm:$0xf]  ;;  %vm221_vm1 = vcmask 31744   ;;  %s401_s24 = sshll.u32 %s570_s15, 3 }
  0x22   : > { %214 = vperm.xlu0 %465, %v211_v2   ;;  %s292_s5 = scalar_lea.hbm %s733_s3, %s401_s24  ;;  %s206_s6 = scalar_lea.vmem [#allocation5], %s389_s18 }
  0x23   : > { %s294_s7 = sshll.u32 %s206_s6, 4  ;;  %s296_s8 = sshll.u32 %s292_s5, 4  ;;  %s295_s7 = int_to_ptr.vmem [resolvable:$true] %s294_s7  ;;  %s297_s8 = int_to_ptr.hbm [resolvable:$true] %s296_s8 }
  0x24   : > { %s279_s15 = scalar_lea.sflag [#allocation4], %s675_s11  ;;  %s510_s9 = sshra.s32 %s297_s8, 4  ;;  %s511_s9 = int_to_ptr.hbm [resolvable:$true] %s510_s9 }
  0x25   : > { %s512_s10 = scalar_lea.hbm %s511_s9, 8  ;;  %s516_s18 = scalar_lea.hbm %s733_s3, 16 }
  0x26   : > { %p513_p4 = scmp.ne.s32.totalorder %s511_s9, %s512_s10  ;;  %p517_p7 = scmp.lt.s32.totalorder %s511_s9, %s733_s3 }
  0x27   : > { %p518_p8 = scmp.lt.s32.totalorder %s516_s18, %s512_s10 }
  0x28   : > { %v219_v4 = vld.sshfl [vmem:[#allocation1] sm:$0xff pattern:$0x75316420]  ;;  %v220_v5 = vld.sshfl [vmem:[#allocation1 + $0x8] sm:$0xff pattern:$0x75316420]  ;;  %p514_p5 = pnand %p513_p4, %p652_p9 }
  0x29   : > { %391 = vmatpush.msk.msra.mxu0 %vm225_vm0, %v219_v4  ;;  %393 = vmatpush.msk.msra.mxu1 %vm225_vm0, %v220_v5  ;;  %p519_p10 = por %p518_p8, %p517_p7 }
  0x2a   : > { %392 = vmatmul.msk.f32.vlgmr.msra.gmra.mxu0 %vm221_vm1, %v210_v3  ;;  %394 = vmatmul.msk.f32.vlgmr.msra.gmra.mxu1 %vm221_vm1, %v210_v3  ;;  %p515_p6 = pneg %p514_p5 }
  0x2c   : > { %p520_p13 = pnand %p519_p10, %p515_p6 }
  0x94   : > { %v215_v6 = vpop.permute.xlu0 %214 }
  0xa7   : > { %v247_v7 = vpop.f32.mrf.mxu0  ;;  %v267_v8 = vpop.f32.mrf.mxu1 }
  0xa8   : > { %v248_v9 = vadd.f32 %v247_v7, %v215_v6  ;;  %v268_v10 = vadd.f32 %v267_v8, %v215_v6 }
  0xaa   : > { %v271_v11 = vmax.f32 %v268_v10, 0.0  ;;  %v270_v12 = vmax.f32 %v248_v9, 0.0 }
  0xac   : > { %v274_v13 = vrot.slane %v271_v11, 4 }
  0xae   : > { %v275_v14 = vsel %vm225_vm0, %v270_v12, %v274_v13 }
  0xaf   : > { %277 = vst [vmem:[%s206_s6] sm:$0xff] %v275_v14 }
  0xb0   : > { %523 = shalt.err (!%p520_p13)
}
  0xb1   : > { %404 = dma.vmem_to_hbm [thread:$0]  (%p652_p9), %s295_s7, 128, %s297_s8, %s279_s15  }
  0xb2 PF: > { %s308_s11 = sand.u32 1, %s558_s12   ;;  %p411_p0 = pnand %p384_p12, %p659_p11 }
  0xb3   : > { %s309_s28 = scalar_lea.sflag [#allocation4], %s308_s11 }
  0xb4   : > { %p412_p1 = pneg %p411_p0 }
  0xb6   : > { %553 = dma.done.wait (%p412_p1), %s309_s28, 128  }
  0xb7   : > { %555 = vsyncadd (%p412_p1), %s309_s28, 4294967168  ;;  %s19_s17 = sadd.s32 1, %s578_s17   ;;  %s738_s12 = smov %s562_s13 }
  0xb8   : > { %p16_p2 = scmp.ge.s32.totalorder %s19_s17, 4   ;;  %s739_s13 = smov %s566_s14 }
  0xb9   : > { %s740_s14 = smov %s657_s26  ;;  %s741_s15 = smov %s574_s16 }
  0xba   : > { %s742_s16 = smov %s744_s20  ;;  %18 = sbr.rel (!%p16_p2) target bundleno = 6 (0x6), region = 77 }
  0xbf   :  { %315 = vsyncpa [#allocation3], 1 }
  0xc0   :  { %317 = vsyncpa [#allocation3 + $0x1], 1 }
  0xc1   :  { %318 = vsyncpa [#allocation4], 1 }
  0xc2   :  { %320 = vsyncpa [#allocation4 + $0x1], 1 }

</bundles_post_ra>
